<compile_context>
chip_gen: v7x
topology: tpu7x:2x2x1
jax: 0.10.0
libtpu: 0.0.40
codegen_flags: <defaults>
</compile_context>

<pallas_src>
import functools

import jax
import jax.numpy as jnp
from jax import lax
from jax.experimental import pallas as pl
from jax.experimental.pallas import tpu as pltpu


# ----------------------------- helpers -------------------------------------

_VMEM_BUDGET = 40 * 1024 * 1024      # tile-sizing budget (fits v7x 64 MiB phys)
_VMEM_LIMIT = 48 * 1024 * 1024       # scoped-VMEM limit passed to Mosaic


def _round_up(n, m):
    return ((n + m - 1) // m) * m


def _cdiv(a, b):
    return -(-a // b)


def _pick_row_chunk(rows, e, g, x_bytes, gx_bytes, w_bytes,
                    budget=_VMEM_BUDGET):
    """Largest power-of-two row chunk (<=1024, >=8) whose double-buffered
    in/out tiles plus the resident W_ih^T fit the VMEM budget."""
    fixed = 2 * e * g * w_bytes + 2 * g * 4
    cap = 1024
    while cap > 8 and fixed + 2 * cap * (e * x_bytes + g * gx_bytes) > budget:
        cap //= 2
    return min(cap, rows)            # rows and cap are both multiples of 8


def _pick_batch_tile(b_pad, cap=64):
    """Batch tile (multiple of 8) dividing b_pad; bounds vreg pressure and
    provides a 'parallel' grid axis for megacore / v7x 2-TC sharding."""
    if b_pad <= cap:
        return b_pad
    for c in (64, 32, 16, 8):
        if b_pad % c == 0:
            return c
    return 8


def _pick_time_chunk(t_len, b_tile, g, hp, op, gx_bytes, w_bytes,
                     budget=_VMEM_BUDGET):
    """Time-chunk length Tc and padded sequence length T_pad (= n_chunks*Tc).

    No exact-divisor requirement: for t_len larger than the VMEM-derived cap,
    Tc = ceil(T / ceil(T/cap)) so padding waste is < n_chunks steps
    (no 'prime T => Tc=1' cliff)."""
    fixed = (2 * hp * (g + op) * w_bytes        # W_hh^T, W_lin^T (double-buffered)
             + 4 * b_tile * hp * 4              # h / c scratch
             + 2 * b_tile * op * 4 + 2 * op * 4)
    cap = 64
    while cap > 4 and fixed + 2 * cap * b_tile * g * gx_bytes > budget:
        cap //= 2
    if t_len <= cap:
        return t_len, t_len
    n_chunks = _cdiv(t_len, cap)
    tc = _cdiv(t_len, n_chunks)
    return tc, n_chunks * tc


# ----------------------------- kernels -------------------------------------


def input_proj_kernel(x_ref, w_ref, b_ref, gx_ref):
    """gates_x = x @ W_ih^T(padded) + (b_ih + b_hh)(padded); fully parallel."""
    gx_ref[...] = (
        jnp.dot(x_ref[...], w_ref[...], preferred_element_type=jnp.float32)
        + b_ref[...]
    ).astype(gx_ref.dtype)


def lstm_recurrence_kernel(t_total, needs_mask, gx_ref, whh_ref, wlin_ref,
                           blin_ref, out_ref, h_sc, c_sc):
    """Serial LSTM recurrence over one (batch-tile, time-chunk) block + fused
    final Linear at the last time chunk.

    Padding invariants (do not break): W_ih/W_hh/bias padding is zero in the
    padded gate lanes AND h/c scratch is zeroed at time-chunk 0, so padded
    hidden lanes stay exactly 0 (g = tanh(0) = 0, c stays 0 under f = 0.5).
    """
    t_idx = pl.program_id(1)                 # time-chunk index (innermost)
    tc = gx_ref.shape[0]
    bt, hp = h_sc.shape

    @pl.when(t_idx == 0)
    def _():
        h_sc[...] = jnp.zeros_like(h_sc)
        c_sc[...] = jnp.zeros_like(c_sc)

    base = t_idx * tc

    # Bound vreg pressure: full unroll only while the per-step gate live range
    # (bt x 4*hp f32) stays comfortably inside the 64-vreg file.
    per_step_vregs = (bt * 4 * hp) // 1024
    unroll = True if per_step_vregs <= 16 else 2

    def step(t, carry):
        h, c = carry
        # gates = gates_x[t] + h_{t-1} @ W_hh^T  (bias folded into gates_x);
        # gates_x is stored bf16 (perf path) and promoted to f32 here.
        gates = gx_ref[t].astype(jnp.float32) + jnp.dot(
            h.astype(whh_ref.dtype), whh_ref[...],
            preferred_element_type=jnp.float32)
        # PyTorch LSTM gate order: i, f, g, o — each slice is 128-lane aligned.
        i_g = jax.nn.sigmoid(gates[:, 0 * hp:1 * hp])
        f_g = jax.nn.sigmoid(gates[:, 1 * hp:2 * hp])
        g_g = jnp.tanh(gates[:, 2 * hp:3 * hp])
        o_g = jax.nn.sigmoid(gates[:, 3 * hp:4 * hp])
        c_new = f_g * c + i_g * g_g
        h_new = o_g * jnp.tanh(c_new)
        if needs_mask:
            # Mask out padded timesteps (T_pad > T): keep previous h/c.
            m = ((base + t) < t_total).astype(jnp.float32)
            h_new = h + m * (h_new - h)
            c_new = c + m * (c_new - c)
        return h_new, c_new

    # Unrolled inner loop: h/c stay in vregs across the chunk.
    h_fin, c_fin = lax.fori_loop(0, tc, step, (h_sc[...], c_sc[...]),
                                 unroll=unroll)
    h_sc[...] = h_fin
    c_sc[...] = c_fin

    @pl.when(t_idx == pl.num_programs(1) - 1)
    def _():
        # Final Linear on the last hidden state; output padded to 128 lanes.
        out_ref[...] = (
            jnp.dot(h_fin.astype(wlin_ref.dtype), wlin_ref[...],
                    preferred_element_type=jnp.float32)
            + blin_ref[...]
        ).astype(out_ref.dtype)


# ----------------------------- wrapper --------------------------------------


def rnn_forward(inputs, params, mm_dtype=jnp.bfloat16):
    """inputs: (B, T) int32 token ids -> (B, output_size) float32."""
    B, T = inputs.shape
    embed_w = params["embed"]                     # (V, E)
    E = embed_w.shape[1]
    H = params["w_hh"].shape[1]                   # w_hh: (4H, H)
    O = params["w_lin"].shape[0]                  # w_lin: (O, H)

    B_pad = _round_up(max(B, 8), 8)               # sublane alignment
    Hp = _round_up(H, 128)                        # per-gate lane alignment
    Op = _round_up(O, 128)                        # lane-dense output
    G = 4 * Hp

    gx_dtype = mm_dtype                           # gates_x at operand precision
    x_bytes = gx_bytes = jnp.dtype(gx_dtype).itemsize
    w_bytes = jnp.dtype(mm_dtype).itemsize

    Bt = _pick_batch_tile(B_pad)
    Tc, T_pad = _pick_time_chunk(T, Bt, G, Hp, Op, gx_bytes, w_bytes)
    needs_mask = (T_pad != T)

    # ---- Embedding lookup (XLA glue; data-dependent gather). ----------------
    # TODO(synk): the embedding gather (padding_idx=1 row is a zero row in the
    # table) stays in XLA.  We pad/transpose only the tiny int32 ids so the
    # gather directly yields the time-major, batch-padded layout — no (B,T,E)
    # transpose/pad passes over the embedded activations.
    ids = jnp.pad(inputs, ((0, B_pad - B), (0, T_pad - T)), constant_values=1)
    ids_t = ids.T                                             # (T_pad, B_pad)
    x = jnp.take(embed_w.astype(mm_dtype), ids_t, axis=0)     # (T_pad, B_pad, E)

    # ---- Gate-padded weight layouts (gate k occupies lanes [k*Hp, k*Hp+H)). --
    def pad_gates_out(w_t):                       # (K, 4H) -> (K, 4*Hp)
        K = w_t.shape[0]
        w4 = w_t.reshape(K, 4, H)
        w4 = jnp.pad(w4, ((0, 0), (0, 0), (0, Hp - H)))
        return w4.reshape(K, G)

    wih_p = pad_gates_out(params["w_ih"].T.astype(jnp.float32))          # (E, G)
    whh_p = jnp.pad(pad_gates_out(params["w_hh"].T.astype(jnp.float32)),
                    ((0, Hp - H), (0, 0)))                                # (Hp, G)
    bias_p = pad_gates_out((params["b_ih"] + params["b_hh"])
                           .reshape(1, 4 * H).astype(jnp.float32))        # (1, G)
    wlin_p = jnp.pad(params["w_lin"].T.astype(jnp.float32),
                     ((0, Hp - H), (0, Op - O)))                          # (Hp, Op)
    blin_p = jnp.pad(params["b_lin"].reshape(1, -1).astype(jnp.float32),
                     ((0, 0), (0, Op - O)))                               # (1, Op)

    # ---- 1) Input projection for all timesteps: one large parallel matmul. --
    rows = T_pad * B_pad
    x_flat = x.reshape(rows, E)
    Rc = _pick_row_chunk(rows, E, G, x_bytes, gx_bytes, w_bytes)

    gates_x = pl.pallas_call(
        input_proj_kernel,
        out_shape=jax.ShapeDtypeStruct((rows, G), gx_dtype),
        grid_spec=pltpu.PrefetchScalarGridSpec(
            num_scalar_prefetch=0,
            grid=(pl.cdiv(rows, Rc),),            # cdiv grid: no divisor cliff
            in_specs=[
                pl.BlockSpec((Rc, E), lambda r: (r, 0)),   # x rows chunk
                pl.BlockSpec((E, G), lambda r: (0, 0)),    # W_ih^T (padded)
                pl.BlockSpec((1, G), lambda r: (0, 0)),    # folded bias
            ],
            out_specs=pl.BlockSpec((Rc, G), lambda r: (r, 0)),
        ),
        compiler_params=pltpu.CompilerParams(
            dimension_semantics=("parallel",),
            vmem_limit_bytes=_VMEM_LIMIT),
    )(x_flat, wih_p.astype(mm_dtype), bias_p)
    gates_x = gates_x.reshape(T_pad, B_pad, G)

    # ---- 2) Serial recurrence: batch tiles ("parallel") x time chunks
    #         ("arbitrary"), with the final Linear fused at the last chunk. ---
    kernel = functools.partial(lstm_recurrence_kernel, T, needs_mask)

    out_pad = pl.pallas_call(
        kernel,
        out_shape=jax.ShapeDtypeStruct((B_pad, Op), jnp.float32),
        grid_spec=pltpu.PrefetchScalarGridSpec(
            num_scalar_prefetch=0,
            grid=(B_pad // Bt, T_pad // Tc),
            in_specs=[
                pl.BlockSpec((Tc, Bt, G), lambda b, t: (t, b, 0)),  # gates_x
                pl.BlockSpec((Hp, G), lambda b, t: (0, 0)),         # W_hh^T
                pl.BlockSpec((Hp, Op), lambda b, t: (0, 0)),        # W_lin^T
                pl.BlockSpec((1, Op), lambda b, t: (0, 0)),         # b_lin
            ],
            out_specs=pl.BlockSpec((Bt, Op), lambda b, t: (b, 0)),
            scratch_shapes=[
                pltpu.VMEM((Bt, Hp), jnp.float32),   # h
                pltpu.VMEM((Bt, Hp), jnp.float32),   # c
            ],
        ),
        compiler_params=pltpu.CompilerParams(
            dimension_semantics=("parallel", "arbitrary"),
            vmem_limit_bytes=_VMEM_LIMIT),
    )(gates_x, whh_p.astype(mm_dtype), wlin_p.astype(mm_dtype), blin_p)

    return out_pad[:B, :O]


# ----------------------------- reference ------------------------------------


def rnn_reference(inputs, params):
    """Pure-JAX f32 reference of the same forward pass (for verification)."""
    x = jnp.take(params["embed"], inputs, axis=0)      # (B, T, E)
    B, T, _ = x.shape
    H = params["w_hh"].shape[1]
    h = jnp.zeros((B, H), jnp.float32)
    c = jnp.zeros((B, H), jnp.float32)
    wih_t = params["w_ih"].T
    whh_t = params["w_hh"].T
    b = params["b_ih"] + params["b_hh"]
    for t in range(T):
        gates = x[:, t, :] @ wih_t + h @ whh_t + b
        i = jax.nn.sigmoid(gates[:, 0 * H:1 * H])
        f = jax.nn.sigmoid(gates[:, 1 * H:2 * H])
        g = jnp.tanh(gates[:, 2 * H:3 * H])
        o = jax.nn.sigmoid(gates[:, 3 * H:4 * H])
        c = f * c + i * g
        h = o * jnp.tanh(c)
    return h @ params["w_lin"].T + params["b_lin"]


def init_params(key, vocab, embed_size, hidden_size, output_size):
    ks = jax.random.split(key, 7)
    scale = 0.1
    embed = scale * jax.random.normal(ks[0], (vocab, embed_size), jnp.float32)
    embed = embed.at[1].set(0.0)  # padding_idx=1 row is zero-initialized
    return {
        "embed": embed,
        "w_ih": scale * jax.random.normal(ks[1], (4 * hidden_size, embed_size), jnp.float32),
        "w_hh": scale * jax.random.normal(ks[2], (4 * hidden_size, hidden_size), jnp.float32),
        "b_ih": scale * jax.random.normal(ks[3], (4 * hidden_size,), jnp.float32),
        "b_hh": scale * jax.random.normal(ks[4], (4 * hidden_size,), jnp.float32),
        "w_lin": scale * jax.random.normal(ks[5], (output_size, hidden_size), jnp.float32),
        "b_lin": scale * jax.random.normal(ks[6], (output_size,), jnp.float32),
    }


if __name__ == "__main__":
    # small shapes consistent with the module's forward: inputs (B, T) token ids
    B, T = 2, 8
    VOCAB, EMBED, HIDDEN, OUT = 20, 16, 32, 4

    key = jax.random.PRNGKey(0)
    k_in, k_par = jax.random.split(key)
    inputs = jax.random.randint(k_in, (B, T), 0, VOCAB, dtype=jnp.int32)
    params = init_params(k_par, VOCAB, EMBED, HIDDEN, OUT)

    ref = rnn_reference(inputs, params)

    # f32 MXU-operand path: tight numerical check.
    out_f32 = jax.block_until_ready(rnn_forward(inputs, params, mm_dtype=jnp.float32))
    assert out_f32.shape == (B, OUT)
    assert jnp.allclose(out_f32, ref, atol=1e-4, rtol=1e-4), (out_f32, ref)

    # bf16 MXU-operand path (default perf path): loose check vs f32 reference.
    # NOTE: bf16 h re-quantization compounds over T, so this tolerance is only
    # appropriate for short sequences / small H (here T=8, H=32).
    out_bf16 = jax.block_until_ready(rnn_forward(inputs, params))
    assert out_bf16.shape == (B, OUT)
    assert jnp.allclose(out_bf16, ref, atol=1e-2, rtol=1e-2), (out_bf16, ref)

    print("KERNEL_OK")
</pallas_src>

<mosaic_0001>
module attributes {stable_mosaic.version = 11 : i64} {
  func.func @input_proj_kernel(%arg0: i32, %arg1: memref<64x16xf32, #tpu.memory_space<vmem>>, %arg2: memref<16x512xf32, #tpu.memory_space<vmem>>, %arg3: memref<1x512xf32, #tpu.memory_space<vmem>>, %arg4: memref<64x512xf32, #tpu.memory_space<vmem>>) attributes {dimension_semantics = [#tpu.dimension_semantics<parallel>], iteration_bounds = array<i64: 1>, scalar_prefetch = 0 : i64, scratch_operands = 0 : i64, tpu.core_type = #tpu.core_type<tc>, window_params = [{transform_indices = @transform_0, window_bounds = array<i64: 64, 16>}, {pipeline_mode = #tpu.pipeline_mode<synchronous>, transform_indices = @transform_1, window_bounds = array<i64: 16, 512>}, {pipeline_mode = #tpu.pipeline_mode<synchronous>, transform_indices = @transform_2, window_bounds = array<i64: 1, 512>}, {transform_indices = @transform_3, window_bounds = array<i64: 64, 512>}]} {
    %c0 = arith.constant 0 : index
    %c0_0 = arith.constant 0 : index
    %0 = vector.load %arg1[%c0, %c0_0] : memref<64x16xf32, #tpu.memory_space<vmem>>, vector<64x16xf32>
    %c0_1 = arith.constant 0 : index
    %c0_2 = arith.constant 0 : index
    %1 = vector.load %arg2[%c0_1, %c0_2] : memref<16x512xf32, #tpu.memory_space<vmem>>, vector<16x512xf32>
    %cst = arith.constant dense<0.000000e+00> : vector<64x512xf32>
    %2 = tpu.matmul %0, %1, %cst {dimension_numbers = #tpu.dot_dimension_numbers<[1], [0], [0], [1], [0, 0, 1, 1], [], []>} : vector<64x16xf32>, vector<16x512xf32>, vector<64x512xf32> -> vector<64x512xf32>
    %c0_3 = arith.constant 0 : index
    %c0_4 = arith.constant 0 : index
    %3 = vector.load %arg3[%c0_3, %c0_4] : memref<1x512xf32, #tpu.memory_space<vmem>>, vector<1x512xf32>
    %4 = vector.broadcast %3 : vector<1x512xf32> to vector<64x512xf32>
    %5 = arith.addf %2, %4 : vector<64x512xf32>
    %c0_5 = arith.constant 0 : index
    %c0_6 = arith.constant 0 : index
    %6 = vector.load %arg4[%c0_5, %c0_6] : memref<64x512xf32, #tpu.memory_space<vmem>>, vector<64x512xf32>
    tpu.vector_store %arg4[%c0_5, %c0_6], %5 {strides = array<i32>} : memref<64x512xf32, #tpu.memory_space<vmem>>, vector<64x512xf32>,
    return
  }
  func.func @transform_0(%arg0: i32) -> (i32, i32) {
    %c0_i32 = arith.constant 0 : i32
    %c0_i32_0 = arith.constant 0 : i32
    return %arg0, %c0_i32 : i32, i32
  }
  func.func @transform_1(%arg0: i32) -> (i32, i32) {
    %c0_i32 = arith.constant 0 : i32
    %c0_i32_0 = arith.constant 0 : i32
    %c0_i32_1 = arith.constant 0 : i32
    return %c0_i32, %c0_i32_0 : i32, i32
  }
  func.func @transform_2(%arg0: i32) -> (i32, i32) {
    %c0_i32 = arith.constant 0 : i32
    %c0_i32_0 = arith.constant 0 : i32
    %c0_i32_1 = arith.constant 0 : i32
    return %c0_i32, %c0_i32_0 : i32, i32
  }
  func.func @transform_3(%arg0: i32) -> (i32, i32) {
    %c0_i32 = arith.constant 0 : i32
    %c0_i32_0 = arith.constant 0 : i32
    return %arg0, %c0_i32 : i32, i32
  }
}

</mosaic_0001>

<bundles_post_ra>
// kernel: tpu_custom_call.1
= control target key start
LH: loop header
LB: loop body
LE: loop exit
PB: predicated region body
PF: predicated region fallthrough
CT: control target
= control target key end

     0   :  { %v404_v7 = vmov 0.0   ;;  %vm53_vm0 = vcmask 130048   ;;  %s547_s0 = inlined_call_operand.vmem [shape: f32[64,16], index: 0, kind: input, shape index: {}]   ;;  %s548_s1 = inlined_call_operand.vmem [shape: f32[16,512], index: 1, kind: input, shape index: {}]   ;;  %s549_s2 = inlined_call_operand.vmem [shape: f32[1,512], index: 2, kind: input, shape index: {}]   ;;  %s550_s3 = inlined_call_operand.hbm [shape: f32[64,512], index: 3, kind: output, shape index: {}]  }
   0x1   :  { %v24_v0 = vld [vmem:[%s548_s1 + $0x8] sm:$0xff]  ;;  %v26_v2 = vld [vmem:[%s548_s1 + $0x18] sm:$0xff]  ;;  %v23_v5 = vld [vmem:[%s548_s1] sm:$0xff]  ;;  %142 = vmatprep.mubr.f32.mxu0 %v404_v7  ;;  %255 = vmatprep.mubr.f32.mxu1 %v404_v7 }
   0x2   :  { %v28_v1 = vld [vmem:[%s548_s1 + $0x28] sm:$0xff]  ;;  %v30_v4 = vld [vmem:[%s548_s1 + $0x38] sm:$0xff]  ;;  %v27_v6 = vld [vmem:[%s548_s1 + $0x20] sm:$0xff] }
   0x3   :  { %v368_v3 = vpack.c.bf16 %v28_v1, %v24_v0  ;;  %v372_v8 = vpack.c.bf16 %v30_v4, %v26_v2  ;;  %v370_v9 = vpack.c.bf16 %v27_v6, %v23_v5  ;;  %v25_v10 = vld [vmem:[%s548_s1 + $0x10] sm:$0xff]  ;;  %v15_v13 = vld [vmem:[%s547_s0] sm:$0xff] }
   0x4   :  { %v29_v11 = vld [vmem:[%s548_s1 + $0x30] sm:$0xff] }
   0x5   :  { %369 = vmatprep.subr.bf16.mxu0 %v368_v3  ;;  %v374_v12 = vpack.c.bf16 %v29_v11, %v25_v10  ;;  %373 = vmatprep.subr.bf16.mxu1 %v372_v8 }
   0x6   :  { %371 = vmatpush1.bf16.msra.mxu0 %v370_v9 }
   0x7   :  { %375 = vmatpush1.bf16.msra.mxu1 %v374_v12 }
   0x8   :  { %8 = vsyncpa [#allocation3], 0  ;;  %v16_v14 = vld [vmem:[%s547_s0 + $0x8] sm:$0xff]  ;;  %v17_v15 = vld [vmem:[%s547_s0 + $0x10] sm:$0xff]  ;;  %v33_v21 = vlaneseq }
   0x9   :  { %352 = vmatmul.mubr.msk.f32.vlgmr.msra.gmra.mrb[0].mxu0 %vm53_vm0, %v15_v13  ;;  %v18_v16 = vld [vmem:[%s547_s0 + $0x18] sm:$0xff]  ;;  %v19_v17 = vld [vmem:[%s547_s0 + $0x20] sm:$0xff]  ;;  %v20_v18 = vld [vmem:[%s547_s0 + $0x28] sm:$0xff] }
   0xa   :  { %360 = vmatmul.mubr.msk.f32.vlgmr.msra.gmra.mrb[0].mxu1 %vm53_vm0, %v15_v13  ;;  %148 = vmatprep.mubr.f32.mxu0 %v404_v7  ;;  %v21_v19 = vld [vmem:[%s547_s0 + $0x30] sm:$0xff]  ;;  %v22_v20 = vld [vmem:[%s547_s0 + $0x38] sm:$0xff]  ;;  %v34_v22 = vshrl.u32 %v33_v21, 7  ;;  %v31_v24 = vld [vmem:[%s549_s2] sm:$0xf]  ;;  %s405_s0 = smov [#allocation2]  }
   0xb   :  { %261 = vmatprep.mubr.f32.mxu1 %v404_v7  ;;  %s341_s2 = sshll.u32 %s405_s0, 4  ;;  %s342_s2 = int_to_ptr.vmem [resolvable:$true] %s341_s2 }
   0xc   :  { %v35_v23 = vsub.s32 0, %v34_v22  ;;  %v43_v25 = vsub.s32 2, %v34_v22  ;;  %v39_v26 = vsub.s32 1, %v34_v22  ;;  %v47_v27 = vsub.s32 3, %v34_v22  ;;  %s380_s18 = scalar_lea.vmem %s342_s2, 4096  ;;  %p385_p1 = scmp.lt.s32.totalorder %s342_s2, %s342_s2 }
   0xd   :  { %353 = vmatmul.mubr.msk.f32.gmra.mrb[2].mxu0 %vm53_vm0, %v16_v14  ;;  %p381_p0 = scmp.ne.s32.totalorder %s342_s2, %s380_s18  ;;  %p386_p2 = scmp.lt.s32.totalorder %s380_s18, %s380_s18 }
   0xe   :  { %361 = vmatmul.mubr.msk.f32.gmra.mrb[2].mxu1 %vm53_vm0, %v16_v14  ;;  %154 = vmatprep.mubr.f32.mxu0 %v404_v7  ;;  %v495_v28 = vrot.slane %v31_v24, %v35_v23  ;;  %v497_v29 = vrot.slane %v31_v24, %v43_v25  ;;  %v499_v30 = vrot.slane %v31_v24, %v39_v26 }
   0xf   :  { %267 = vmatprep.mubr.f32.mxu1 %v404_v7  ;;  %v501_v31 = vrot.slane %v31_v24, %v47_v27  ;;  %p387_p3 = por %p386_p2, %p385_p1 }
  0x11   :  { %354 = vmatmul.mubr.msk.f32.gmra.mrb[4].mxu0 %vm53_vm0, %v17_v15  ;;  %p388_p4 = pnand %p387_p3, %p381_p0 }
  0x12   :  { %362 = vmatmul.mubr.msk.f32.gmra.mrb[4].mxu1 %vm53_vm0, %v17_v15  ;;  %160 = vmatprep.mubr.f32.mxu0 %v404_v7 }
  0x13   :  { %273 = vmatprep.mubr.f32.mxu1 %v404_v7 }
  0x15   :  { %355 = vmatmul.mubr.msk.f32.gmra.mrb[6].mxu0 %vm53_vm0, %v18_v16 }
  0x16   :  { %363 = vmatmul.mubr.msk.f32.gmra.mrb[6].mxu1 %vm53_vm0, %v18_v16  ;;  %166 = vmatprep.mubr.f32.mxu0 %v404_v7 }
  0x17   :  { %279 = vmatprep.mubr.f32.mxu1 %v404_v7 }
  0x19   :  { %356 = vmatmul.mubr.msk.f32.gmra.mrb[8].mxu0 %vm53_vm0, %v19_v17 }
  0x1a   :  { %364 = vmatmul.mubr.msk.f32.gmra.mrb[8].mxu1 %vm53_vm0, %v19_v17  ;;  %172 = vmatprep.mubr.f32.mxu0 %v404_v7 }
  0x1b   :  { %285 = vmatprep.mubr.f32.mxu1 %v404_v7 }
  0x1d   :  { %357 = vmatmul.mubr.msk.f32.gmra.mrb[10].mxu0 %vm53_vm0, %v20_v18 }
  0x1e   :  { %365 = vmatmul.mubr.msk.f32.gmra.mrb[10].mxu1 %vm53_vm0, %v20_v18  ;;  %178 = vmatprep.mubr.f32.mxu0 %v404_v7 }
  0x1f   :  { %291 = vmatprep.mubr.f32.mxu1 %v404_v7 }
  0x21   :  { %358 = vmatmul.mubr.msk.f32.gmra.mrb[12].mxu0 %vm53_vm0, %v21_v19 }
  0x22   :  { %366 = vmatmul.mubr.msk.f32.gmra.mrb[12].mxu1 %vm53_vm0, %v21_v19  ;;  %184 = vmatprep.mubr.f32.mxu0 %v404_v7 }
  0x23   :  { %297 = vmatprep.mubr.f32.mxu1 %v404_v7 }
  0x25   :  { %359 = vmatmul.mubr.msk.f32.gmra.mrb[14].mxu0 %vm53_vm0, %v22_v20 }
  0x26   :  { %367 = vmatmul.mubr.msk.f32.gmra.mrb[14].mxu1 %vm53_vm0, %v22_v20 }
  0xdc   :  { %v144_v32 = vpop.f32.mrb[0].mxu0 }
  0xdd   :  { %v145_v33 = vadd.f32 %v144_v32, %v495_v28  ;;  %v257_v34 = vpop.f32.mrb[0].mxu1  ;;  %v146_v35 = vpop.f32.mrb[1].mxu0 }
  0xde   :  { %v258_v36 = vadd.f32 %v257_v34, %v497_v29  ;;  %v147_v37 = vadd.f32 %v146_v35, %v499_v30  ;;  %v259_v38 = vpop.f32.mrb[1].mxu1 }
  0xdf   :  { %304 = vst [vmem:[#allocation2] sm:$0xff] %v145_v33  ;;  %v260_v39 = vadd.f32 %v259_v38, %v501_v31 }
  0xe0   :  { %306 = vst [vmem:[#allocation2 + $0x10] sm:$0xff] %v258_v36  ;;  %305 = vst [vmem:[#allocation2 + $0x8] sm:$0xff] %v147_v37  ;;  %v150_v40 = vpop.f32.mrb[2].mxu0 }
  0xe1   :  { %307 = vst [vmem:[#allocation2 + $0x18] sm:$0xff] %v260_v39  ;;  %v151_v41 = vadd.f32 %v150_v40, %v495_v28  ;;  %v263_v42 = vpop.f32.mrb[2].mxu1  ;;  %v152_v43 = vpop.f32.mrb[3].mxu0 }
  0xe2   :  { %v264_v44 = vadd.f32 %v263_v42, %v497_v29  ;;  %v153_v45 = vadd.f32 %v152_v43, %v499_v30  ;;  %v265_v46 = vpop.f32.mrb[3].mxu1 }
  0xe3   :  { %308 = vst [vmem:[#allocation2 + $0x20] sm:$0xff] %v151_v41  ;;  %v266_v47 = vadd.f32 %v265_v46, %v501_v31 }
  0xe4   :  { %310 = vst [vmem:[#allocation2 + $0x30] sm:$0xff] %v264_v44  ;;  %309 = vst [vmem:[#allocation2 + $0x28] sm:$0xff] %v153_v45  ;;  %v156_v48 = vpop.f32.mrb[4].mxu0 }
  0xe5   :  { %311 = vst [vmem:[#allocation2 + $0x38] sm:$0xff] %v266_v47  ;;  %v157_v49 = vadd.f32 %v156_v48, %v495_v28  ;;  %v269_v50 = vpop.f32.mrb[4].mxu1  ;;  %v158_v51 = vpop.f32.mrb[5].mxu0 }
  0xe6   :  { %v270_v52 = vadd.f32 %v269_v50, %v497_v29  ;;  %v159_v53 = vadd.f32 %v158_v51, %v499_v30  ;;  %v271_v54 = vpop.f32.mrb[5].mxu1 }
  0xe7   :  { %312 = vst [vmem:[#allocation2 + $0x40] sm:$0xff] %v157_v49  ;;  %v272_v55 = vadd.f32 %v271_v54, %v501_v31 }
  0xe8   :  { %314 = vst [vmem:[#allocation2 + $0x50] sm:$0xff] %v270_v52  ;;  %313 = vst [vmem:[#allocation2 + $0x48] sm:$0xff] %v159_v53  ;;  %v162_v56 = vpop.f32.mrb[6].mxu0 }
  0xe9   :  { %315 = vst [vmem:[#allocation2 + $0x58] sm:$0xff] %v272_v55  ;;  %v163_v57 = vadd.f32 %v162_v56, %v495_v28  ;;  %v275_v58 = vpop.f32.mrb[6].mxu1  ;;  %v164_v59 = vpop.f32.mrb[7].mxu0 }
  0xea   :  { %v276_v60 = vadd.f32 %v275_v58, %v497_v29  ;;  %v165_v61 = vadd.f32 %v164_v59, %v499_v30  ;;  %v277_v62 = vpop.f32.mrb[7].mxu1 }
  0xeb   :  { %316 = vst [vmem:[#allocation2 + $0x60] sm:$0xff] %v163_v57  ;;  %v278_v63 = vadd.f32 %v277_v62, %v501_v31 }
  0xec   :  { %318 = vst [vmem:[#allocation2 + $0x70] sm:$0xff] %v276_v60  ;;  %317 = vst [vmem:[#allocation2 + $0x68] sm:$0xff] %v165_v61  ;;  %v168_v0 = vpop.f32.mrb[8].mxu0 }
  0xed   :  { %319 = vst [vmem:[#allocation2 + $0x78] sm:$0xff] %v278_v63  ;;  %v169_v1 = vadd.f32 %v168_v0, %v495_v28  ;;  %v281_v2 = vpop.f32.mrb[8].mxu1  ;;  %v170_v3 = vpop.f32.mrb[9].mxu0 }
  0xee   :  { %v282_v4 = vadd.f32 %v281_v2, %v497_v29  ;;  %v171_v5 = vadd.f32 %v170_v3, %v499_v30  ;;  %v283_v6 = vpop.f32.mrb[9].mxu1 }
  0xef   :  { %320 = vst [vmem:[#allocation2 + $0x80] sm:$0xff] %v169_v1  ;;  %v284_v7 = vadd.f32 %v283_v6, %v501_v31 }
  0xf0   :  { %322 = vst [vmem:[#allocation2 + $0x90] sm:$0xff] %v282_v4  ;;  %321 = vst [vmem:[#allocation2 + $0x88] sm:$0xff] %v171_v5  ;;  %v174_v8 = vpop.f32.mrb[10].mxu0 }
  0xf1   :  { %323 = vst [vmem:[#allocation2 + $0x98] sm:$0xff] %v284_v7  ;;  %v175_v9 = vadd.f32 %v174_v8, %v495_v28  ;;  %v287_v10 = vpop.f32.mrb[10].mxu1  ;;  %v176_v11 = vpop.f32.mrb[11].mxu0 }
  0xf2   :  { %v288_v12 = vadd.f32 %v287_v10, %v497_v29  ;;  %v177_v13 = vadd.f32 %v176_v11, %v499_v30  ;;  %v289_v14 = vpop.f32.mrb[11].mxu1 }
  0xf3   :  { %324 = vst [vmem:[#allocation2 + $0xa0] sm:$0xff] %v175_v9  ;;  %v290_v15 = vadd.f32 %v289_v14, %v501_v31 }
  0xf4   :  { %326 = vst [vmem:[#allocation2 + $0xb0] sm:$0xff] %v288_v12  ;;  %325 = vst [vmem:[#allocation2 + $0xa8] sm:$0xff] %v177_v13  ;;  %v180_v16 = vpop.f32.mrb[12].mxu0 }
  0xf5   :  { %327 = vst [vmem:[#allocation2 + $0xb8] sm:$0xff] %v290_v15  ;;  %v181_v17 = vadd.f32 %v180_v16, %v495_v28  ;;  %v293_v18 = vpop.f32.mrb[12].mxu1  ;;  %v182_v19 = vpop.f32.mrb[13].mxu0 }
  0xf6   :  { %v294_v20 = vadd.f32 %v293_v18, %v497_v29  ;;  %v183_v21 = vadd.f32 %v182_v19, %v499_v30  ;;  %v295_v22 = vpop.f32.mrb[13].mxu1 }
  0xf7   :  { %328 = vst [vmem:[#allocation2 + $0xc0] sm:$0xff] %v181_v17  ;;  %v296_v23 = vadd.f32 %v295_v22, %v501_v31 }
  0xf8   :  { %330 = vst [vmem:[#allocation2 + $0xd0] sm:$0xff] %v294_v20  ;;  %329 = vst [vmem:[#allocation2 + $0xc8] sm:$0xff] %v183_v21  ;;  %v186_v24 = vpop.f32.mrb[14].mxu0 }
  0xf9   :  { %331 = vst [vmem:[#allocation2 + $0xd8] sm:$0xff] %v296_v23  ;;  %v187_v25 = vadd.f32 %v186_v24, %v495_v28  ;;  %v299_v26 = vpop.f32.mrb[14].mxu1  ;;  %v188_v27 = vpop.f32.mrb[15].mxu0 }
  0xfa   :  { %v300_v32 = vadd.f32 %v299_v26, %v497_v29  ;;  %v189_v33 = vadd.f32 %v188_v27, %v499_v30  ;;  %v301_v34 = vpop.f32.mrb[15].mxu1 }
  0xfb   :  { %332 = vst [vmem:[#allocation2 + $0xe0] sm:$0xff] %v187_v25  ;;  %v302_v35 = vadd.f32 %v301_v34, %v501_v31 }
  0xfc   :  { %334 = vst [vmem:[#allocation2 + $0xf0] sm:$0xff] %v300_v32  ;;  %333 = vst [vmem:[#allocation2 + $0xe8] sm:$0xff] %v189_v33 }
  0xfd   :  { %335 = vst [vmem:[#allocation2 + $0xf8] sm:$0xff] %v302_v35 }
  0xfe   :  { %391 = shalt.err (!%p388_p4)
}
  0xff   :  { %s392_s21 = scalar_lea.hbm %s550_s3, 4096 }
 0x100   :  { %p393_p5 = scmp.ne.s32.totalorder %s550_s3, %s392_s21  ;;  %p396_p6 = scmp.lt.u32.totalorder %s392_s21, %s550_s3 }
 0x102   :  { %p398_p7 = pnand %p396_p6, %p393_p5 }
 0x104   :  { %401 = shalt.err (!%p398_p7)
}
 0x105   :  { %s406_s26 = smov 512   ;;  %s407_s27 = smov 32  }
 0x106   :  { %347 = dma.vmem_to_hbm [thread:$0]  %s342_s2, 4096, %s550_s3, [#allocation3], %s406_s26, %s406_s26, %s407_s27  }
 0x107   :  { %402 = dma.done.wait [#allocation3], 4096  }
 0x108   :  { %403 = vsyncadd [#allocation3], 4294963200 }
 0x109   :  { %351 = vsyncpa [#allocation3], 1 }

</bundles_post_ra>
